<compile_context>
chip_gen: v7x
topology: tpu7x:2x2x1
jax: 0.10.0
libtpu: 0.0.40
codegen_flags: <defaults>
</compile_context>

<pallas_src>
import functools

import jax
import jax.numpy as jnp
from jax.experimental import pallas as pl
from jax.experimental.pallas import tpu as pltpu

_NEG_BIG = -1e30  # finite "-inf" for padded class columns (safe under softmax)


def _round_up(x, m):
    return pl.cdiv(x, m) * m


def _vmem_capacity_bytes():
    """Trace-time query of per-core VMEM capacity; conservative fallback."""
    try:
        info = pltpu.get_tpu_info()
        cap = getattr(info, "vmem_capacity_bytes", None)
        if cap and int(cap) > 0:
            return int(cap)
    except Exception:
        pass
    return 64 * 1024 * 1024  # v7x per-TensorCore VMEM (smallest current gen)


def _softmax_last(logits):
    m = jnp.max(logits, axis=-1, keepdims=True)
    e = jnp.exp(logits - m)
    s = jnp.sum(e, axis=-1, keepdims=True)
    return e / s  # exact normalization; runs only in the finalize epilogue


def _classifier_kernel_resident(x_ref, w_ref, b_ref, o_ref, *, with_softmax):
    """Single-pass tile: out = softmax(x @ W + b).  Weight block is constant
    across the whole grid, so Pallas DMAs it from HBM exactly once.

    x_ref: (TB, F)  w_ref: (F, Cp)  b_ref: (1, Cp)  o_ref: (TB, Cp)
    """
    logits = jnp.dot(x_ref[...], w_ref[...], preferred_element_type=jnp.float32)
    logits = logits + b_ref[...].astype(jnp.float32)
    out = _softmax_last(logits) if with_softmax else logits
    o_ref[...] = out.astype(o_ref.dtype)


def _classifier_kernel_tiled(x_ref, w_ref, b_ref, o_ref, acc_ref, *, with_softmax):
    """K-tiled fallback for weights that do not fit VMEM.

    Grid = (batch tiles [parallel], feature tiles K [arbitrary, reduction]).
    x_ref: (TB, TK)  w_ref: (TK, Cp)  b_ref: (1, Cp)
    o_ref: (TB, Cp)  acc_ref: (TB, Cp) f32 scratch accumulator over K.
    """
    k = pl.program_id(1)
    partial = jnp.dot(x_ref[...], w_ref[...], preferred_element_type=jnp.float32)

    @pl.when(k == 0)
    def _first():
        acc_ref[...] = partial  # direct store: no zero-fill + RMW at k == 0

    @pl.when(k > 0)
    def _accumulate():
        acc_ref[...] += partial

    @pl.when(k == pl.num_programs(1) - 1)
    def _finalize():
        logits = acc_ref[...] + b_ref[...].astype(jnp.float32)
        out = _softmax_last(logits) if with_softmax else logits
        o_ref[...] = out.astype(o_ref.dtype)


def prepare_classifier_params(weight, bias, compute_dtype=None):
    """One-time parameter prep (hoisted out of the per-call path).

    PyTorch nn.Linear stores weight as (C, F); pre-transpose to (F, C) and lift
    bias to (1, C) so the kernel computes a plain x @ W + b.  Optionally cast
    the weight to a lower-precision compute dtype (e.g. bf16) once here."""
    w_t = jnp.transpose(weight)
    if compute_dtype is not None:
        w_t = w_t.astype(compute_dtype)
    return w_t, bias.reshape(1, -1)


def classifier_forward(x, w_t, b2, with_softmax=True, *, compute_dtype=None,
                       _force_tk=None):
    """x: (B, F);  w_t: (F, C) [pre-transposed];  b2: (1, C).  -> (B, C)."""
    B, F = x.shape
    Fw, C = w_t.shape
    assert Fw == F and b2.shape == (1, C)

    if compute_dtype is not None:
        # Optional reduced-precision matmul operands (f32 accumulation kept).
        x = x.astype(compute_dtype)
        w_t = w_t.astype(compute_dtype)

    out_dtype = x.dtype
    ix = x.dtype.itemsize
    iw = w_t.dtype.itemsize
    io = jnp.dtype(out_dtype).itemsize

    # --- class (lane) axis padding --------------------------------------------
    # 256-multiple when C > 128 (v6e/v7x MXU is 256 wide in N), else 128.
    lane = 256 if C > 128 else 128
    Cp = _round_up(C, lane)
    if Cp != C:
        w_t = jnp.pad(w_t, ((0, 0), (0, Cp - C)))
        b2 = jnp.pad(b2, ((0, 0), (0, Cp - C)), constant_values=_NEG_BIG)

    # --- generation-aware VMEM budget ------------------------------------------
    vmem_cap = _vmem_capacity_bytes()
    vmem_budget = int(min((vmem_cap * 3) // 4, 100 * 1024 * 1024))

    # --- batch tiling -----------------------------------------------------------
    # >= 2 batch tiles whenever possible so v7x's second TensorCore has work;
    # tiles up to 512 rows to amortize grid-step / finalize overhead.
    Bp8 = _round_up(B, 8)
    if Bp8 <= 8:
        TB = Bp8
    else:
        TB = min(512, _round_up(pl.cdiv(Bp8, 2), 8))
    Bp = _round_up(B, TB)
    if Bp != B:
        x = jnp.pad(x, ((0, Bp - B), (0, 0)))
    nb = Bp // TB

    # --- plan selection: weight-resident (preferred) vs K-tiled fallback -------
    # Resident working set (blocks are double-buffered by the pipeline).
    resident_ws = (2 * F * Cp * iw        # weight
                   + 2 * TB * F * ix      # x tile
                   + 2 * TB * Cp * io     # out tile
                   + 2 * Cp * iw)         # bias
    use_resident = (_force_tk is None) and (resident_ws <= vmem_budget)

    if use_resident:
        out = pl.pallas_call(
            functools.partial(_classifier_kernel_resident,
                              with_softmax=with_softmax),
            out_shape=jax.ShapeDtypeStruct((Bp, Cp), out_dtype),
            grid_spec=pltpu.PrefetchScalarGridSpec(
                num_scalar_prefetch=0,
                grid=(nb,),
                in_specs=[
                    pl.BlockSpec((TB, F), lambda i: (i, 0)),    # x tile
                    pl.BlockSpec((F, Cp), lambda i: (0, 0)),    # resident weight
                    pl.BlockSpec((1, Cp), lambda i: (0, 0)),    # bias (tiny)
                ],
                out_specs=pl.BlockSpec((TB, Cp), lambda i: (i, 0)),
            ),
            compiler_params=pltpu.CompilerParams(
                dimension_semantics=("parallel",),
                vmem_limit_bytes=vmem_budget,
            ),
            cost_estimate=pl.CostEstimate(
                flops=2 * Bp * F * Cp,
                transcendentals=(Bp * Cp) if with_softmax else 0,
                bytes_accessed=(Bp * F * ix + F * Cp * iw
                                + Cp * iw + Bp * Cp * io),
            ),
        )(x, w_t, b2)
        return out[:B, :C]

    # --- K-tiled fallback (weight too large for VMEM) ---------------------------
    if _force_tk is not None:
        TK = _force_tk
    else:
        TK = 256
        for cand in (2048, 1024, 512, 256):
            ws = (2 * TB * cand * ix + 2 * cand * Cp * iw
                  + 2 * TB * Cp * io + TB * Cp * 4 + 2 * Cp * iw)
            if cand < F and ws <= vmem_budget:
                TK = cand
                break
    Fp = _round_up(F, TK)
    if Fp != F:  # zero padding contributes nothing to the dot
        x = jnp.pad(x, ((0, 0), (0, Fp - F)))
        w_t = jnp.pad(w_t, ((0, Fp - F), (0, 0)))
    nk = Fp // TK

    out = pl.pallas_call(
        functools.partial(_classifier_kernel_tiled, with_softmax=with_softmax),
        out_shape=jax.ShapeDtypeStruct((Bp, Cp), out_dtype),
        grid_spec=pltpu.PrefetchScalarGridSpec(
            num_scalar_prefetch=0,
            grid=(nb, nk),
            in_specs=[
                pl.BlockSpec((TB, TK), lambda i, k: (i, k)),   # x tile
                pl.BlockSpec((TK, Cp), lambda i, k: (k, 0)),   # weight K-slab
                pl.BlockSpec((1, Cp), lambda i, k: (0, 0)),    # bias (tiny)
            ],
            out_specs=pl.BlockSpec((TB, Cp), lambda i, k: (i, 0)),
            scratch_shapes=[pltpu.VMEM((TB, Cp), jnp.float32)],
        ),
        compiler_params=pltpu.CompilerParams(
            dimension_semantics=("parallel", "arbitrary"),
            vmem_limit_bytes=vmem_budget,
        ),
        cost_estimate=pl.CostEstimate(
            flops=2 * Bp * Fp * Cp,
            transcendentals=(Bp * Cp) if with_softmax else 0,
            # K-tiled path re-streams the weight once per batch tile.
            bytes_accessed=(Bp * Fp * ix + nb * Fp * Cp * iw
                            + Cp * iw + Bp * Cp * io),
        ),
    )(x, w_t, b2)
    return out[:B, :C]


if __name__ == "__main__":
    key = jax.random.PRNGKey(0)

    def linear_init(k, C, F):
        # nn.Linear(n_features, num_classes): weight (C, F); bias zeroed in __init__.
        bound = 1.0 / jnp.sqrt(jnp.float32(F))
        w = jax.random.uniform(k, (C, F), jnp.float32, minval=-bound, maxval=bound)
        b = jnp.zeros((C,), jnp.float32)
        return w, b

    def ref_forward(x, w, b, with_softmax):
        logits = x @ w.T + b
        return jax.nn.softmax(logits, axis=-1) if with_softmax else logits

    # --- case 1: small shapes implied by the module (weight-resident path) -----
    B, F, C = 8, 32, 16
    k1, k2, key = jax.random.split(key, 3)
    x = jax.random.normal(k1, (B, F), dtype=jnp.float32)  # base_model = identity
    w, b = linear_init(k2, C, F)
    w_t, b2 = prepare_classifier_params(w, b)

    out = jax.block_until_ready(classifier_forward(x, w_t, b2, with_softmax=True))
    ref = ref_forward(x, w, b, True)
    assert out.shape == (B, C)
    assert jnp.allclose(out, ref, atol=2e-3, rtol=2e-3)
    assert jnp.allclose(jnp.sum(out, axis=-1), 1.0, atol=2e-3)

    out_lin = jax.block_until_ready(classifier_forward(x, w_t, b2, with_softmax=False))
    assert jnp.allclose(out_lin, ref_forward(x, w, b, False), atol=1e-4, rtol=1e-4)

    # --- case 2: batch/class padding + 2 batch tiles (megacore split) ----------
    B, F, C = 300, 200, 100
    k1, k2, key = jax.random.split(key, 3)
    x = jax.random.normal(k1, (B, F), dtype=jnp.float32)
    w, b = linear_init(k2, C, F)
    w_t, b2 = prepare_classifier_params(w, b)

    out = jax.block_until_ready(classifier_forward(x, w_t, b2, with_softmax=True))
    ref = ref_forward(x, w, b, True)
    assert out.shape == (B, C)
    assert jnp.allclose(out, ref, atol=2e-3, rtol=2e-3)
    assert jnp.allclose(jnp.sum(out, axis=-1), 1.0, atol=2e-3)

    # --- case 3: forced K-tiled fallback path (accumulator over the K axis) ----
    B, F, C = 16, 512, 24
    k1, k2, key = jax.random.split(key, 3)
    x = jax.random.normal(k1, (B, F), dtype=jnp.float32)
    w, b = linear_init(k2, C, F)
    w_t, b2 = prepare_classifier_params(w, b)

    out = jax.block_until_ready(
        classifier_forward(x, w_t, b2, with_softmax=True, _force_tk=256))
    ref = ref_forward(x, w, b, True)
    assert out.shape == (B, C)
    assert jnp.allclose(out, ref, atol=2e-3, rtol=2e-3)

    out_lin = jax.block_until_ready(
        classifier_forward(x, w_t, b2, with_softmax=False, _force_tk=256))
    assert jnp.allclose(out_lin, ref_forward(x, w, b, False), atol=2e-3, rtol=2e-3)

    print("KERNEL_OK")
</pallas_src>

<mosaic_0001>
module attributes {stable_mosaic.version = 11 : i64} {
  func.func @_classifier_kernel_resident(%arg0: i32, %arg1: memref<8x32xf32, #tpu.memory_space<vmem>>, %arg2: memref<32x128xf32, #tpu.memory_space<vmem>>, %arg3: memref<1x128xf32, #tpu.memory_space<vmem>>, %arg4: memref<8x128xf32, #tpu.memory_space<vmem>>) attributes {dimension_semantics = [#tpu.dimension_semantics<parallel>], iteration_bounds = array<i64: 1>, scalar_prefetch = 0 : i64, scratch_operands = 0 : i64, tpu.core_type = #tpu.core_type<tc>, window_params = [{transform_indices = @transform_0, window_bounds = array<i64: 8, 32>}, {pipeline_mode = #tpu.pipeline_mode<synchronous>, transform_indices = @transform_1, window_bounds = array<i64: 32, 128>}, {pipeline_mode = #tpu.pipeline_mode<synchronous>, transform_indices = @transform_2, window_bounds = array<i64: 1, 128>}, {transform_indices = @transform_3, window_bounds = array<i64: 8, 128>}]} {
    %c0 = arith.constant 0 : index
    %c0_0 = arith.constant 0 : index
    %0 = vector.load %arg1[%c0, %c0_0] : memref<8x32xf32, #tpu.memory_space<vmem>>, vector<8x32xf32>
    %c0_1 = arith.constant 0 : index
    %c0_2 = arith.constant 0 : index
    %1 = vector.load %arg2[%c0_1, %c0_2] : memref<32x128xf32, #tpu.memory_space<vmem>>, vector<32x128xf32>
    %cst = arith.constant dense<0.000000e+00> : vector<8x128xf32>
    %2 = tpu.matmul %0, %1, %cst {dimension_numbers = #tpu.dot_dimension_numbers<[1], [0], [0], [1], [0, 0, 1, 1], [], []>} : vector<8x32xf32>, vector<32x128xf32>, vector<8x128xf32> -> vector<8x128xf32>
    %c0_3 = arith.constant 0 : index
    %c0_4 = arith.constant 0 : index
    %3 = vector.load %arg3[%c0_3, %c0_4] : memref<1x128xf32, #tpu.memory_space<vmem>>, vector<1x128xf32>
    %4 = vector.broadcast %3 : vector<1x128xf32> to vector<8x128xf32>
    %5 = arith.addf %2, %4 : vector<8x128xf32>
    %cst_5 = arith.constant dense<0xFF800000> : vector<8xf32>
    %6 = vector.multi_reduction <maximumf>, %5, %cst_5 [1] : vector<8x128xf32> to vector<8xf32>
    %7 = vector.shape_cast %6 : vector<8xf32> to vector<8x1xf32>
    %8 = vector.broadcast %7 : vector<8x1xf32> to vector<8x128xf32>
    %9 = arith.subf %5, %8 : vector<8x128xf32>
    %10 = math.exp %9 : vector<8x128xf32>
    %cst_6 = arith.constant dense<0.000000e+00> : vector<8xf32>
    %11 = vector.multi_reduction <add>, %10, %cst_6 [1] : vector<8x128xf32> to vector<8xf32>
    %12 = vector.shape_cast %11 : vector<8xf32> to vector<8x1xf32>
    %13 = vector.broadcast %12 : vector<8x1xf32> to vector<8x128xf32>
    %14 = arith.divf %10, %13 : vector<8x128xf32>
    %c0_7 = arith.constant 0 : index
    %c0_8 = arith.constant 0 : index
    %15 = vector.load %arg4[%c0_7, %c0_8] : memref<8x128xf32, #tpu.memory_space<vmem>>, vector<8x128xf32>
    tpu.vector_store %arg4[%c0_7, %c0_8], %14 {strides = array<i32>} : memref<8x128xf32, #tpu.memory_space<vmem>>, vector<8x128xf32>,
    return
  }
  func.func @transform_0(%arg0: i32) -> (i32, i32) {
    %c0_i32 = arith.constant 0 : i32
    %c0_i32_0 = arith.constant 0 : i32
    return %arg0, %c0_i32 : i32, i32
  }
  func.func @transform_1(%arg0: i32) -> (i32, i32) {
    %c0_i32 = arith.constant 0 : i32
    %c0_i32_0 = arith.constant 0 : i32
    %c0_i32_1 = arith.constant 0 : i32
    return %c0_i32, %c0_i32_0 : i32, i32
  }
  func.func @transform_2(%arg0: i32) -> (i32, i32) {
    %c0_i32 = arith.constant 0 : i32
    %c0_i32_0 = arith.constant 0 : i32
    %c0_i32_1 = arith.constant 0 : i32
    return %c0_i32, %c0_i32_0 : i32, i32
  }
  func.func @transform_3(%arg0: i32) -> (i32, i32) {
    %c0_i32 = arith.constant 0 : i32
    %c0_i32_0 = arith.constant 0 : i32
    return %arg0, %c0_i32 : i32, i32
  }
}

</mosaic_0001>

<bundles_post_ra>
// kernel: tpu_custom_call.1
= control target key start
LH: loop header
LB: loop body
LE: loop exit
PB: predicated region body
PF: predicated region fallthrough
CT: control target
= control target key end

     0   :  { %8 = vsyncpa [#allocation3], 0  ;;  %s335_s0 = inlined_call_operand.hbm [shape: f32[8,32], index: 0, kind: input, shape index: {}]   ;;  %s336_s1 = inlined_call_operand.hbm [shape: f32[32,128], index: 1, kind: input, shape index: {}]   ;;  %s337_s2 = inlined_call_operand.vmem [shape: f32[1,128], index: 2, kind: input, shape index: {}]   ;;  %s338_s3 = inlined_call_operand.hbm [shape: f32[8,128], index: 3, kind: output, shape index: {}]  }
   0x1   :  { %9 = vsyncpa [#allocation6], 0 }
   0x2   :  { %10 = vsyncpa [#allocation4], 0  ;;  %s261_s12 = smov [#allocation2]   ;;  %s262_s14 = smov [#allocation5]  }
   0x3   :  { %s17_s13 = sshll.u32 %s261_s12, 4  ;;  %s26_s15 = sshll.u32 %s262_s14, 4  ;;  %s18_s13 = int_to_ptr.vmem [resolvable:$true] %s17_s13  ;;  %s289_s15 = int_to_ptr.vmem [resolvable:$true] %s26_s15 }
   0x4   :  { %s189_s18 = scalar_lea.hbm %s335_s0, 128 }
   0x5   :  { %p190_p0 = scmp.ne.s32.totalorder %s335_s0, %s189_s18  ;;  %p193_p1 = scmp.lt.u32.totalorder %s189_s18, %s335_s0 }
   0x7   :  { %p195_p2 = pnand %p193_p1, %p190_p0 }
   0x9   :  { %198 = shalt.err (!%p195_p2)
}
   0xa   :  { %s199_s23 = scalar_lea.vmem %s18_s13, 128  ;;  %p204_p4 = scmp.lt.s32.totalorder %s18_s13, %s18_s13 }
   0xb   :  { %p200_p3 = scmp.ne.s32.totalorder %s18_s13, %s199_s23  ;;  %p205_p5 = scmp.lt.s32.totalorder %s199_s23, %s199_s23 }
   0xd   :  { %p206_p6 = por %p205_p5, %p204_p4 }
   0xf   :  { %p207_p7 = pnand %p206_p6, %p200_p3 }
  0x11   :  { %210 = shalt.err (!%p207_p7)
}
  0x12   :  { %20 = dma.hbm_to_vmem [thread:$0]  %s335_s0, 128, %s18_s13, [#allocation3]  }
  0x13   :  { %s211_s28 = scalar_lea.hbm %s336_s1, 512 }
  0x14   :  { %p212_p8 = scmp.ne.s32.totalorder %s336_s1, %s211_s28  ;;  %p215_p9 = scmp.lt.u32.totalorder %s211_s28, %s336_s1 }
  0x16   :  { %p217_p10 = pnand %p215_p9, %p212_p8 }
  0x18   :  { %220 = shalt.err (!%p217_p10)
}
  0x19   :  { %s221_s6 = scalar_lea.vmem %s289_s15, 512  ;;  %p226_p12 = scmp.lt.s32.totalorder %s289_s15, %s289_s15 }
  0x1a   :  { %p222_p11 = scmp.ne.s32.totalorder %s289_s15, %s221_s6  ;;  %p227_p13 = scmp.lt.s32.totalorder %s221_s6, %s221_s6 }
  0x1c   :  { %p228_p0 = por %p227_p13, %p226_p12 }
  0x1e   :  { %p229_p1 = pnand %p228_p0, %p222_p11 }
  0x20   :  { %232 = shalt.err (!%p229_p1)
}
  0x21   :  { %s263_s0 = smov 128   ;;  %s264_s7 = smov 8  }
  0x22   :  { %32 = dma.hbm_to_vmem [thread:$0]  %s336_s1, 512, %s289_s15, [#allocation6], %s263_s0, %s263_s0, %s264_s7  }
  0x23   :  { %255 = dma.done.wait [#allocation3], 128  }
  0x24   :  { %256 = vsyncadd [#allocation3], 4294967168 }
  0x25   :  { %257 = dma.done.wait [#allocation6], 512  }
  0x26   :  { %258 = vsyncadd [#allocation6], 4294966784  ;;  %v265_v0 = vmov 0.0|0.0   ;;  %vm266_vm0 = vmmov 0   ;;  %v267_v1 = vmov 0.0   ;;  %v42_v2 = vld [vmem:[#allocation5] sm:$0xff] }
  0x27   :  { %171 = vmatprep.subr.bf16.mxu0 %v265_v0  ;;  %168 = vmatprep.mubr.msk.f32.mxu0 %vm266_vm0, %v267_v1  ;;  %v43_v3 = vld [vmem:[#allocation5 + $0x8] sm:$0xff]  ;;  %v44_v4 = vld [vmem:[#allocation5 + $0x10] sm:$0xff]  ;;  %v45_v6 = vld [vmem:[#allocation5 + $0x18] sm:$0xff]  ;;  %vm53_vm1 = vcmask 261120   ;;  %s268_s11 = smov [#allocation7]  }
  0x28   :  { %v172_v5 = vpack.c.bf16 %v43_v3, %v42_v2  ;;  %v175_v7 = vpack.c.bf16 %v45_v6, %v44_v4  ;;  %v41_v8 = vld [vmem:[#allocation2] sm:$0xff]  ;;  %s143_s12 = sshll.u32 %s268_s11, 4  ;;  %s144_s12 = int_to_ptr.vmem [resolvable:$true] %s143_s12 }
  0x29   :  { %v153_v9 = vld [vmem:[%s337_s2] ss:$0 sm:$0xff]  ;;  %s233_s13 = scalar_lea.vmem %s144_s12, 128  ;;  %p238_p3 = scmp.lt.s32.totalorder %s144_s12, %s144_s12 }
  0x2a   :  { %173 = vmatpush3.bf16.msra.mxu0 %v172_v5  ;;  %p234_p2 = scmp.ne.s32.totalorder %s144_s12, %s233_s13  ;;  %p239_p4 = scmp.lt.s32.totalorder %s233_s13, %s233_s13 }
  0x2b   :  { %174 = vmatprep.subr.bf16.mxu0 %v265_v0 }
  0x2c   :  { %p240_p5 = por %p239_p4, %p238_p3 }
  0x2e   :  { %176 = vmatpush3.bf16.msra.mxu0 %v175_v7  ;;  %p241_p6 = pnand %p240_p5, %p234_p2 }
  0x31   :  { %169 = vmatmul.mubr.msk.f32.vlgmr.msra.gmra.mrb[0].mxu0 %vm53_vm1, %v41_v8 }
 0x104   :  { %v123_v10 = vpop.f32.mrb[0].mxu0 }
 0x105   :  { %v124_v11 = vadd.f32 %v153_v9, %v123_v10  ;;  %v170_v12 = vpop.f32.mrb[1].mxu0 }
 0x107   :  { %127 = vmax.xlane.f32.xlu0 %v124_v11 }
 0x194   :  { %v128_v13 = vpop.xlane.xlu0 %127 }
 0x195   :  { %v129_v14 = vsub.f32 %v124_v11, %v128_v13 }
 0x197   :  { %v130_v15 = vmul.f32 1.442695, %v129_v14 }
 0x199   :  { %185 = vpow2.f32 %v130_v15 }
 0x1a3   :  { %v186_v16 = vpop.eup %185 }
 0x1a4   :  { %132 = vadd.xlane.f32.xlu0 %v186_v16 }
 0x231   :  { %v133_v17 = vpop.xlane.xlu0 %132 }
 0x232   :  { %187 = vrcp.f32 %v133_v17 }
 0x23c   :  { %v188_v18 = vpop.eup %187 }
 0x23d   :  { %v135_v19 = vmul.f32 %v188_v18, %v186_v16 }
 0x23f   :  { %136 = vst [vmem:[#allocation7] sm:$0xff] %v135_v19 }
 0x240   :  { %244 = shalt.err (!%p241_p6)
}
 0x241   :  { %s245_s15 = scalar_lea.hbm %s338_s3, 128 }
 0x242   :  { %p246_p7 = scmp.ne.s32.totalorder %s338_s3, %s245_s15  ;;  %p249_p8 = scmp.lt.u32.totalorder %s245_s15, %s338_s3 }
 0x244   :  { %p251_p9 = pnand %p249_p8, %p246_p7 }
 0x246   :  { %254 = shalt.err (!%p251_p9)
}
 0x247   :  { %146 = dma.vmem_to_hbm [thread:$0]  %s144_s12, 128, %s338_s3, [#allocation4]  }
 0x248   :  { %259 = dma.done.wait [#allocation4], 128  }
 0x249   :  { %260 = vsyncadd [#allocation4], 4294967168 }
 0x24a   :  { %150 = vsyncpa [#allocation3], 1 }
 0x24b   :  { %151 = vsyncpa [#allocation6], 1 }
 0x24c   :  { %152 = vsyncpa [#allocation4], 1 }

</bundles_post_ra>
